<compile_context>
chip_gen: v6e
topology: v6e:2x2x1
jax: 0.10.0
libtpu: 0.0.40
codegen_flags: <defaults>
</compile_context>

<pallas_src>
import functools
import math

import jax
import jax.numpy as jnp
from jax import lax
from jax.experimental import pallas as pl
from jax.experimental.pallas import tpu as pltpu


def get_positional_encoding(d_model: int, max_len: int = 5000) -> jnp.ndarray:
    """Standard sinusoidal positional encoding, shape [max_len, d_model]."""
    position = jnp.arange(max_len, dtype=jnp.float32)[:, None]          # [L, 1]
    two_i = jnp.arange(0, d_model, 2, dtype=jnp.float32)                # [D/2]
    div_term = jnp.exp(two_i * (-math.log(10000.0) / d_model))          # [D/2]
    pe = jnp.zeros((max_len, d_model), dtype=jnp.float32)
    pe = pe.at[:, 0::2].set(jnp.sin(position * div_term))
    pe = pe.at[:, 1::2].set(jnp.cos(position * div_term))
    return pe


def _vmem_budget_bytes() -> int:
    """Per-generation scoped-VMEM budget (leaves headroom for compiler scratch)."""
    cap = 64 * 1024 * 1024                       # conservative default (v7x per-TC)
    try:
        cap = int(pltpu.get_tpu_info().vmem_capacity_bytes)
    except Exception:
        pass
    return min(int(cap * 0.75), 100 * 1024 * 1024)


def _choose_seq_tile(seq_len, batch, d_model, table_itemsize, n_vocab,
                     resident, budget):
    """Largest ts (multiple of 8) whose tile footprint fits the VMEM budget."""
    out_row = 2 * d_model * 4                                 # dbl-buffered output
    if resident:
        fixed = n_vocab * d_model * table_itemsize            # resident table
        per_row = out_row + n_vocab * 4 + 8                   # + one-hot row + ids
    else:
        fixed = 0
        per_row = out_row + 2 * d_model * table_itemsize      # + dbl-buffered gather
    avail = max(budget - fixed - (2 << 20), 1 << 20)
    tm_cap = max(8 * batch, avail // per_row)
    tm_cap = min(tm_cap, 4096)                                # overhead already amortized
    ts = max(8, ((tm_cap // batch) // 8) * 8)
    ts = min(ts, ((seq_len + 7) // 8) * 8)                    # no padding past one tile
    return ts


# ---------------------------------------------------------------------------
# Fast path: embedding table resident in VMEM, gather via one-hot matmul (MXU).
# ---------------------------------------------------------------------------
def _embed_pe_resident_kernel(ids_ref, emb_ref, pe_ref, sel_ref, out_ref, *, scale):
    # ids_ref: (tm, 1) int32; emb_ref: (n_vocab, d_model) resident table
    # pe_ref:  (ts, d_model);  sel_ref: (tm, ts) resident selection matrix
    tm, _ = out_ref.shape
    n_vocab = emb_ref.shape[0]
    ids = ids_ref[...]                                                    # (tm, 1)
    onehot = (ids == lax.broadcasted_iota(jnp.int32, (tm, n_vocab), 1))
    onehot = onehot.astype(emb_ref.dtype)                                 # (tm, n_vocab)
    emb = jnp.dot(onehot, emb_ref[...], preferred_element_type=jnp.float32)
    pe_slab = jnp.dot(sel_ref[...], pe_ref[...], preferred_element_type=jnp.float32)
    out_ref[...] = (emb * scale + pe_slab).astype(out_ref.dtype)


# ---------------------------------------------------------------------------
# Large-table path: manual double-buffered per-row DMA gather from HBM.
# ---------------------------------------------------------------------------
def _embed_pe_dma_kernel(ids_smem, emb_hbm, pe_ref, sel_ref, out_ref,
                         gather_buf, sem, *, scale, tm):
    i = pl.program_id(0)
    n_tiles = pl.num_programs(0)
    slot = i % 2

    def issue_gather(tile_base, slot_idx):
        def body(r, carry):
            row_id = ids_smem[tile_base + r]
            pltpu.make_async_copy(
                emb_hbm.at[row_id],                  # (d_model,) row in HBM
                gather_buf.at[slot_idx, r],          # (d_model,) row in VMEM
                sem.at[slot_idx],
            ).start()
            return carry
        lax.fori_loop(0, tm, body, 0, unroll=8)

    # Prime the pipeline on the first step.
    @pl.when(i == 0)
    def _():
        issue_gather(0, 0)

    # Prefetch the next tile's rows into the other slot (overlaps this step).
    @pl.when(i + 1 < n_tiles)
    def _():
        issue_gather((i + 1) * tm, 1 - slot)

    # Single wait draining all tm row copies of this slot: DMA semaphores count
    # bytes, so one (tm, d_model)-sized wait matches tm row-start signals.
    pltpu.make_async_copy(gather_buf.at[slot], gather_buf.at[slot],
                          sem.at[slot]).wait()

    emb_tile = gather_buf[slot].astype(jnp.float32)                       # (tm, d_model)
    pe_slab = jnp.dot(sel_ref[...], pe_ref[...], preferred_element_type=jnp.float32)
    out_ref[...] = (emb_tile * scale + pe_slab).astype(out_ref.dtype)


def embeddings_with_positional_encoding(ids, emb_table, pe, *, seq_tile=None,
                                        force_dma=False, out_dtype=jnp.float32):
    """
    ids:       [seq_len, batch] int token ids
    emb_table: [n_vocab, d_model] float32 (or bfloat16) embedding table
    pe:        [max_len, d_model] float32 positional encoding
    returns:   [seq_len, batch, d_model] out_dtype
    """
    seq_len, batch = ids.shape
    n_vocab, d_model = emb_table.shape
    max_len = pe.shape[0]
    scale = float(math.sqrt(d_model))
    itemsize = jnp.dtype(emb_table.dtype).itemsize
    out_itemsize = jnp.dtype(out_dtype).itemsize

    budget = _vmem_budget_bytes()
    table_bytes = n_vocab * d_model * itemsize
    resident = (not force_dma
                and table_bytes <= min(8 << 20, budget // 4)
                and n_vocab <= 4096)

    if seq_tile is None:
        ts = _choose_seq_tile(seq_len, batch, d_model, itemsize, n_vocab,
                              resident, budget)
    else:
        ts = max(8, (int(seq_tile) // 8) * 8)
    seq_pad = ((seq_len + ts - 1) // ts) * ts
    assert seq_pad <= max_len, "sequence (padded) exceeds positional-encoding table"
    tm = ts * batch
    n_tiles = seq_pad // ts
    n_pad = seq_pad * batch

    # Clamp ids (gather has no bounds check) and flatten; row = s*batch + b.
    ids = jnp.clip(ids.astype(jnp.int32), 0, n_vocab - 1)
    ids = jnp.pad(ids, ((0, seq_pad - seq_len), (0, 0)))
    ids_flat = ids.reshape(-1)

    pe_used = pe[:seq_pad].astype(jnp.float32)

    # PE broadcast-over-batch selection: sel[r, c] = 1 iff c == r // batch.
    # Hoisted out of the kernel (depends only on tm/ts/batch), kept resident.
    sel = (jnp.arange(tm, dtype=jnp.int32)[:, None] // batch
           == jnp.arange(ts, dtype=jnp.int32)[None, :]).astype(jnp.float32)

    if resident:
        kernel = functools.partial(_embed_pe_resident_kernel, scale=scale)
        grid_spec = pltpu.PrefetchScalarGridSpec(
            num_scalar_prefetch=0,
            grid=(n_tiles,),
            in_specs=[
                pl.BlockSpec((tm, 1), lambda i: (i, 0)),              # ids
                pl.BlockSpec((n_vocab, d_model), lambda i: (0, 0)),   # table (resident)
                pl.BlockSpec((ts, d_model), lambda i: (i, 0)),        # PE block
                pl.BlockSpec((tm, ts), lambda i: (0, 0)),             # sel (resident)
            ],
            out_specs=pl.BlockSpec((tm, d_model), lambda i: (i, 0)),
        )
        args = (ids_flat.reshape(-1, 1), emb_table, pe_used, sel)
        flops = 2 * n_pad * d_model * (n_vocab + ts)
        bytes_accessed = (table_bytes + n_pad * 4 + seq_pad * d_model * 4
                          + tm * ts * 4 + n_pad * d_model * out_itemsize)
        semantics = ("parallel",)      # no cross-step deps -> v7x megacore OK
    else:
        kernel = functools.partial(_embed_pe_dma_kernel, scale=scale, tm=tm)
        grid_spec = pltpu.PrefetchScalarGridSpec(
            num_scalar_prefetch=1,                                     # ids -> SMEM
            grid=(n_tiles,),
            in_specs=[
                pl.BlockSpec(memory_space=pl.ANY),                     # table in HBM
                pl.BlockSpec((ts, d_model), lambda i, ids: (i, 0)),    # PE block
                pl.BlockSpec((tm, ts), lambda i, ids: (0, 0)),         # sel (resident)
            ],
            out_specs=pl.BlockSpec((tm, d_model), lambda i, ids: (i, 0)),
            scratch_shapes=[
                pltpu.VMEM((2, tm, d_model), emb_table.dtype),         # gather slab
                pltpu.SemaphoreType.DMA((2,)),                         # per-slot sem
            ],
        )
        args = (ids_flat, emb_table, pe_used, sel)
        flops = 2 * n_pad * ts * d_model
        bytes_accessed = (n_pad * d_model * itemsize + n_pad * 4
                          + seq_pad * d_model * 4 + tm * ts * 4
                          + n_pad * d_model * out_itemsize)
        # Cross-step prefetch into the other slot -> axis must stay sequential.
        semantics = ("arbitrary",)

    cost = pl.CostEstimate(flops=int(flops), transcendentals=0,
                           bytes_accessed=int(bytes_accessed))

    out_flat = pl.pallas_call(
        kernel,
        out_shape=jax.ShapeDtypeStruct((n_pad, d_model), out_dtype),
        grid_spec=grid_spec,
        compiler_params=pltpu.CompilerParams(
            dimension_semantics=semantics,
            vmem_limit_bytes=int(budget),
        ),
        cost_estimate=cost,
    )(*args)

    # Free (metadata-only) reshape back to [seq, batch, d_model]; drop padding.
    return out_flat.reshape(seq_pad, batch, d_model)[:seq_len]


if __name__ == "__main__":
    # Small deterministic setup; d_model is lane-dense (multiple of 128).
    d_model = 128
    n_vocab = 64
    max_len = 64
    seq_len = 24
    batch = 2

    key = jax.random.PRNGKey(0)
    k_ids, k_emb = jax.random.split(key)

    ids = jax.random.randint(k_ids, (seq_len, batch), 0, n_vocab, dtype=jnp.int32)
    emb_table = (jax.random.normal(k_emb, (n_vocab, d_model), dtype=jnp.float32)
                 * (1.0 / math.sqrt(d_model)))
    pe = get_positional_encoding(d_model, max_len)

    ref = (jnp.take(emb_table, ids, axis=0) * math.sqrt(d_model)
           + pe[:seq_len][:, None, :])

    # 1) Default dispatch: small table -> VMEM-resident one-hot fast path.
    out = jax.block_until_ready(
        embeddings_with_positional_encoding(ids, emb_table, pe))
    assert out.shape == (seq_len, batch, d_model)
    assert jnp.allclose(out, ref, atol=1e-5, rtol=1e-5)

    # 2) Resident path with forced small tiles (multi-step grid).
    out2 = jax.block_until_ready(
        embeddings_with_positional_encoding(ids, emb_table, pe, seq_tile=8))
    assert jnp.allclose(out2, ref, atol=1e-5, rtol=1e-5)

    # 3) Large-table path: manual double-buffered HBM row-gather DMA.
    out3 = jax.block_until_ready(
        embeddings_with_positional_encoding(ids, emb_table, pe, seq_tile=8,
                                            force_dma=True))
    assert jnp.allclose(out3, ref, atol=1e-5, rtol=1e-5)

    print("KERNEL_OK")
</pallas_src>

<mosaic_0001>
module attributes {stable_mosaic.version = 11 : i64} {
  func.func @_embed_pe_resident_kernel(%arg0: i32, %arg1: memref<48x1xi32, #tpu.memory_space<vmem>>, %arg2: memref<64x128xf32, #tpu.memory_space<vmem>>, %arg3: memref<24x128xf32, #tpu.memory_space<vmem>>, %arg4: memref<48x24xf32, #tpu.memory_space<vmem>>, %arg5: memref<48x128xf32, #tpu.memory_space<vmem>>) attributes {dimension_semantics = [#tpu.dimension_semantics<parallel>], iteration_bounds = array<i64: 1>, scalar_prefetch = 0 : i64, scratch_operands = 0 : i64, tpu.core_type = #tpu.core_type<tc>, window_params = [{transform_indices = @transform_0, window_bounds = array<i64: 48, 1>}, {pipeline_mode = #tpu.pipeline_mode<synchronous>, transform_indices = @transform_1, window_bounds = array<i64: 64, 128>}, {transform_indices = @transform_2, window_bounds = array<i64: 24, 128>}, {pipeline_mode = #tpu.pipeline_mode<synchronous>, transform_indices = @transform_3, window_bounds = array<i64: 48, 24>}, {transform_indices = @transform_4, window_bounds = array<i64: 48, 128>}]} {
    %c0 = arith.constant 0 : index
    %c0_0 = arith.constant 0 : index
    %0 = vector.load %arg1[%c0, %c0_0] : memref<48x1xi32, #tpu.memory_space<vmem>>, vector<48x1xi32>
    %1 = tpu.iota {dimensions = array<i32: 1>} : vector<48x64xi32>
    %2 = vector.broadcast %0 : vector<48x1xi32> to vector<48x64xi32>
    %3 = arith.cmpi eq, %2, %1 : vector<48x64xi32>
    %4 = arith.extui %3 : vector<48x64xi1> to vector<48x64xi32>
    %5 = arith.sitofp %4 : vector<48x64xi32> to vector<48x64xf32>
    %c0_1 = arith.constant 0 : index
    %c0_2 = arith.constant 0 : index
    %6 = vector.load %arg2[%c0_1, %c0_2] : memref<64x128xf32, #tpu.memory_space<vmem>>, vector<64x128xf32>
    %cst = arith.constant dense<0.000000e+00> : vector<48x128xf32>
    %7 = tpu.matmul %5, %6, %cst {dimension_numbers = #tpu.dot_dimension_numbers<[1], [0], [0], [1], [0, 0, 1, 1], [], []>} : vector<48x64xf32>, vector<64x128xf32>, vector<48x128xf32> -> vector<48x128xf32>
    %c0_3 = arith.constant 0 : index
    %c0_4 = arith.constant 0 : index
    %8 = vector.load %arg4[%c0_3, %c0_4] : memref<48x24xf32, #tpu.memory_space<vmem>>, vector<48x24xf32>
    %c0_5 = arith.constant 0 : index
    %c0_6 = arith.constant 0 : index
    %9 = vector.load %arg3[%c0_5, %c0_6] : memref<24x128xf32, #tpu.memory_space<vmem>>, vector<24x128xf32>
    %cst_7 = arith.constant dense<0.000000e+00> : vector<48x128xf32>
    %10 = tpu.matmul %8, %9, %cst_7 {dimension_numbers = #tpu.dot_dimension_numbers<[1], [0], [0], [1], [0, 0, 1, 1], [], []>} : vector<48x24xf32>, vector<24x128xf32>, vector<48x128xf32> -> vector<48x128xf32>
    %cst_8 = arith.constant 11.3137083 : f32
    %11 = vector.broadcast %cst_8 : f32 to vector<48x128xf32>
    %12 = arith.mulf %7, %11 : vector<48x128xf32>
    %13 = arith.addf %12, %10 : vector<48x128xf32>
    %c0_9 = arith.constant 0 : index
    %c0_10 = arith.constant 0 : index
    %14 = vector.load %arg5[%c0_9, %c0_10] : memref<48x128xf32, #tpu.memory_space<vmem>>, vector<48x128xf32>
    tpu.vector_store %arg5[%c0_9, %c0_10], %13 {strides = array<i32>} : memref<48x128xf32, #tpu.memory_space<vmem>>, vector<48x128xf32>,
    return
  }
  func.func @transform_0(%arg0: i32) -> (i32, i32) {
    %c0_i32 = arith.constant 0 : i32
    %c0_i32_0 = arith.constant 0 : i32
    return %arg0, %c0_i32 : i32, i32
  }
  func.func @transform_1(%arg0: i32) -> (i32, i32) {
    %c0_i32 = arith.constant 0 : i32
    %c0_i32_0 = arith.constant 0 : i32
    %c0_i32_1 = arith.constant 0 : i32
    return %c0_i32, %c0_i32_0 : i32, i32
  }
  func.func @transform_2(%arg0: i32) -> (i32, i32) {
    %c0_i32 = arith.constant 0 : i32
    %c0_i32_0 = arith.constant 0 : i32
    return %arg0, %c0_i32 : i32, i32
  }
  func.func @transform_3(%arg0: i32) -> (i32, i32) {
    %c0_i32 = arith.constant 0 : i32
    %c0_i32_0 = arith.constant 0 : i32
    %c0_i32_1 = arith.constant 0 : i32
    return %c0_i32, %c0_i32_0 : i32, i32
  }
  func.func @transform_4(%arg0: i32) -> (i32, i32) {
    %c0_i32 = arith.constant 0 : i32
    %c0_i32_0 = arith.constant 0 : i32
    return %arg0, %c0_i32 : i32, i32
  }
}

</mosaic_0001>

<bundles_post_ra>
// kernel: tpu_custom_call.1
= control target key start
LH: loop header
LB: loop body
LE: loop exit
PB: predicated region body
PF: predicated region fallthrough
CT: control target
= control target key end

     0   :  { %v451_v2 = vmov 0   ;;  %s565_s0 = inlined_call_operand.vmem [shape: s32[48,1], index: 0, kind: input, shape index: {}]   ;;  %s566_s1 = inlined_call_operand.vmem [shape: f32[64,128], index: 1, kind: input, shape index: {}]   ;;  %s567_s2 = inlined_call_operand.vmem [shape: f32[24,128], index: 2, kind: input, shape index: {}]   ;;  %s568_s3 = inlined_call_operand.vmem [shape: f32[48,24], index: 3, kind: input, shape index: {}]   ;;  %s569_s4 = inlined_call_operand.hbm [shape: f32[48,128], index: 4, kind: output, shape index: {}]  }
   0x1   :  { %v20_v0 = vld [vmem:[%s565_s0 + $0x10] sm:$0xff]  ;;  %v18_v1 = vld [vmem:[%s565_s0] sm:$0xff]  ;;  %428 = vset.pattern.permute.xlu1 %v451_v2  ;;  %427 = vset.pattern.permute.xlu0 %v451_v2  ;;  %v69_v3 = vld [vmem:[%s566_s1 + $0x38] sm:$0xff] }
   0x2   :  { %33 = vperm.xlu1 %428, %v20_v0   ;;  %27 = vperm.xlu0 %427, %v18_v1   ;;  %v68_v4 = vld [vmem:[%s566_s1 + $0x30] sm:$0xff]  ;;  %v21_v5 = vld [vmem:[%s565_s0 + $0x18] sm:$0xff]  ;;  %v19_v6 = vld [vmem:[%s565_s0 + $0x8] sm:$0xff] }
   0x3   :  { %382 = vmatprep.subr.mxu0 %v69_v3  ;;  %v192_v7 = vld [vmem:[%s567_s2 + $0x10] sm:$0xff]  ;;  %v67_v8 = vld [vmem:[%s566_s1 + $0x28] sm:$0xff] }
   0x4   :  { %383 = vmatpush3.msra.mxu0 %v69_v3  ;;  %407 = vmatprep.subr.mxu1 %v192_v7  ;;  %v191_v9 = vld [vmem:[%s567_s2 + $0x8] sm:$0xff] }
   0x5   :  { %384 = vmatprep.subr.mxu0 %v68_v4 }
   0x6   :  { %36 = vperm.xlu1 %428, %v21_v5   ;;  %30 = vperm.xlu0 %427, %v19_v6  }
   0x7   :  { %9 = vsyncpa [#allocation3], 0  ;;  %v23_v10 = vld [vmem:[%s565_s0 + $0x28] sm:$0xff]  ;;  %v22_v11 = vld [vmem:[%s565_s0 + $0x20] sm:$0xff]  ;;  %385 = vmatpush3.msra.mxu0 %v68_v4  ;;  %408 = vmatpush3.msra.mxu1 %v192_v7  ;;  %vm193_vm0 = vcmask 195584   ;;  %v24_v24 = vlaneseq  ;;  %vm70_vm1 = vcmask 523264  }
   0x8   :  { %386 = vmatprep.subr.mxu0 %v67_v8  ;;  %v66_v12 = vld [vmem:[%s566_s1 + $0x20] sm:$0xff]  ;;  %409 = vmatprep.subr.mxu1 %v191_v9  ;;  %v65_v14 = vld [vmem:[%s566_s1 + $0x18] sm:$0xff]  ;;  %v185_v16 = vld [vmem:[%s568_s3 + $0x8] sm:$0xff]  ;;  %v452_v28 = vmov 0.0  }
   0x9   :  { %v190_v13 = vld [vmem:[%s567_s2] sm:$0xff]  ;;  %387 = vmatpush3.msra.mxu0 %v67_v8  ;;  %410 = vmatpush3.msra.mxu1 %v191_v9  ;;  %v64_v17 = vld [vmem:[%s566_s1 + $0x10] sm:$0xff]  ;;  %v63_v19 = vld [vmem:[%s566_s1 + $0x8] sm:$0xff]  ;;  %v25_v25 = vand.u32 127, %v24_v24 }
   0xa   :  { %42 = vperm.xlu1 %428, %v23_v10   ;;  %39 = vperm.xlu0 %427, %v22_v11   ;;  %v184_v15 = vld [vmem:[%s568_s3] sm:$0xff]  ;;  %v186_v18 = vld [vmem:[%s568_s3 + $0x10] sm:$0xff]  ;;  %v187_v20 = vld [vmem:[%s568_s3 + $0x18] sm:$0xff] }
   0xb   :  { %388 = vmatprep.subr.mxu0 %v66_v12  ;;  %411 = vmatprep.subr.mxu1 %v190_v13  ;;  %v62_v21 = vld [vmem:[%s566_s1] sm:$0xff]  ;;  %v189_v23 = vld [vmem:[%s568_s3 + $0x28] sm:$0xff]  ;;  %s453_s1 = smov [#allocation2]  }
   0xc   :  { %389 = vmatpush3.msra.mxu0 %v66_v12  ;;  %412 = vmatpush3.msra.mxu1 %v190_v13  ;;  %v188_v22 = vld [vmem:[%s568_s3 + $0x20] sm:$0xff]  ;;  %s330_s3 = sshll.u32 %s453_s1, 4  ;;  %s331_s3 = int_to_ptr.vmem [resolvable:$true] %s330_s3 }
   0xd   :  { %390 = vmatprep.subr.mxu0 %v65_v14  ;;  %413 = vmatprep.mubr.msk.f32.mxu1 %vm193_vm0, %v184_v15  ;;  %s429_s7 = scalar_lea.vmem %s331_s3, 768  ;;  %p434_p1 = scmp.lt.s32.totalorder %s331_s3, %s331_s3 }
   0xe   :  { %391 = vmatpush3.msra.mxu0 %v65_v14  ;;  %414 = vmatmul.mubr.msk.f32.vlgmr.msra.gmra.mxu1 %vm193_vm0, %v185_v16  ;;  %p430_p0 = scmp.ne.s32.totalorder %s331_s3, %s429_s7  ;;  %p435_p2 = scmp.lt.s32.totalorder %s429_s7, %s429_s7 }
   0xf   :  { %392 = vmatprep.subr.mxu0 %v64_v17  ;;  %416 = vmatprep.mubr.msk.f32.mxu1 %vm193_vm0, %v186_v18 }
  0x10   :  { %393 = vmatpush3.msra.mxu0 %v64_v17  ;;  %p436_p3 = por %p435_p2, %p434_p1 }
  0x11   :  { %394 = vmatprep.subr.mxu0 %v63_v19 }
  0x12   :  { %395 = vmatpush3.msra.mxu0 %v63_v19  ;;  %417 = vmatmul.mubr.msk.f32.gmra.mxu1 %vm193_vm0, %v187_v20  ;;  %p437_p4 = pnand %p436_p3, %p430_p0 }
  0x13   :  { %396 = vmatprep.subr.mxu0 %v62_v21  ;;  %419 = vmatprep.mubr.msk.f32.mxu1 %vm193_vm0, %v188_v22 }
  0x14   :  { %397 = vmatpush3.msra.mxu0 %v62_v21 }
  0x16   :  { %420 = vmatmul.mubr.msk.f32.gmra.mxu1 %vm193_vm0, %v189_v23 }
  0x7d   :  { %v34_v26 = vpop.permute.xlu1 %33  ;;  %v28_v27 = vpop.permute.xlu0 %27 }
  0x7e   :  { %vm44_vm2 = vcmp.eq.s32.totalorder %v28_v27, %v25_v25  ;;  %vm46_vm3 = vcmp.eq.s32.totalorder %v34_v26, %v25_v25 }
  0x7f   :  { %v341_v29 = vsel %vm44_vm2, 1.0, %v452_v28  ;;  %v343_v32 = vsel %vm46_vm3, 1.0, %v452_v28 }
  0x80   :  { %398 = vmatprep.mubr.msk.f32.mxu0 %vm70_vm1, %v341_v29 }
  0x81   :  { %v37_v30 = vpop.permute.xlu1 %36  ;;  %v31_v31 = vpop.permute.xlu0 %30 }
  0x82   :  { %vm45_vm4 = vcmp.eq.s32.totalorder %v31_v31, %v25_v25  ;;  %vm47_vm5 = vcmp.eq.s32.totalorder %v37_v30, %v25_v25 }
  0x83   :  { %v342_v33 = vsel %vm45_vm4, 1.0, %v452_v28  ;;  %v344_v36 = vsel %vm47_vm5, 1.0, %v452_v28 }
  0x84   :  { %399 = vmatmul.mubr.msk.f32.vlgmr.msra.gmra.mxu0 %vm70_vm1, %v342_v33 }
  0x85   :  { %v43_v34 = vpop.permute.xlu1 %42  ;;  %401 = vmatprep.mubr.msk.f32.mxu0 %vm70_vm1, %v343_v32  ;;  %v40_v35 = vpop.permute.xlu0 %39 }
  0x86   :  { %vm48_vm6 = vcmp.eq.s32.totalorder %v40_v35, %v25_v25  ;;  %vm49_vm7 = vcmp.eq.s32.totalorder %v43_v34, %v25_v25 }
  0x87   :  { %v345_v37 = vsel %vm48_vm6, 1.0, %v452_v28  ;;  %v346_v38 = vsel %vm49_vm7, 1.0, %v452_v28 }
  0x88   :  { %402 = vmatmul.mubr.msk.f32.gmra.mxu0 %vm70_vm1, %v344_v36 }
  0x89   :  { %404 = vmatprep.mubr.msk.f32.mxu0 %vm70_vm1, %v345_v37 }
  0x8c   :  { %405 = vmatmul.mubr.msk.f32.gmra.mxu0 %vm70_vm1, %v346_v38 }
  0xce   :  { %v415_v39 = vpop.f32.mrf.mxu1 }
  0xd0   :  { %v278_v40 = vpop.f32.mrf.mxu1 }
  0xd2   :  { %v418_v42 = vpop.f32.mrf.mxu1 }
  0xd4   :  { %v288_v48 = vpop.f32.mrf.mxu1 }
  0xd6   :  { %v421_v55 = vpop.f32.mrf.mxu1 }
  0xd8   :  { %v298_v61 = vpop.f32.mrf.mxu1 }
 0x144   :  { %v400_v41 = vpop.f32.mrf.mxu0 }
 0x145   :  { %v308_v43 = vmul.f32 11.313708, %v400_v41 }
 0x146   :  { %v155_v44 = vpop.f32.mrf.mxu0 }
 0x147   :  { %v314_v45 = vadd.f32 %v415_v39, %v308_v43  ;;  %v307_v46 = vmul.f32 11.313708, %v155_v44 }
 0x148   :  { %v403_v47 = vpop.f32.mrf.mxu0 }
 0x149   :  { %320 = vst [vmem:[#allocation2 + $0x8] sm:$0xff] %v314_v45  ;;  %v313_v49 = vadd.f32 %v307_v46, %v278_v40  ;;  %v310_v50 = vmul.f32 11.313708, %v403_v47 }
 0x14a   :  { %v165_v51 = vpop.f32.mrf.mxu0 }
 0x14b   :  { %319 = vst [vmem:[#allocation2] sm:$0xff] %v313_v49  ;;  %v316_v52 = vadd.f32 %v418_v42, %v310_v50  ;;  %v309_v53 = vmul.f32 11.313708, %v165_v51 }
 0x14c   :  { %v406_v54 = vpop.f32.mrf.mxu0 }
 0x14d   :  { %322 = vst [vmem:[#allocation2 + $0x18] sm:$0xff] %v316_v52  ;;  %v315_v56 = vadd.f32 %v309_v53, %v288_v48  ;;  %v312_v57 = vmul.f32 11.313708, %v406_v54 }
 0x14e   :  { %v175_v58 = vpop.f32.mrf.mxu0 }
 0x14f   :  { %321 = vst [vmem:[#allocation2 + $0x10] sm:$0xff] %v315_v56  ;;  %v318_v59 = vadd.f32 %v421_v55, %v312_v57  ;;  %v311_v60 = vmul.f32 11.313708, %v175_v58 }
 0x151   :  { %324 = vst [vmem:[#allocation2 + $0x28] sm:$0xff] %v318_v59  ;;  %v317_v62 = vadd.f32 %v311_v60, %v298_v61 }
 0x153   :  { %323 = vst [vmem:[#allocation2 + $0x20] sm:$0xff] %v317_v62 }
 0x154   :  { %440 = shalt.err (!%p437_p4)
}
 0x155   :  { %s454_s8 = smov 128   ;;  %s455_s9 = smov 8  }
 0x156   :  { %336 = dma.vmem_to_hbm [thread:$0]  %s331_s3, 768, %s569_s4, [#allocation3], %s454_s8, %s454_s8, %s455_s9  }
 0x157   :  { %449 = dma.done.wait [#allocation3], 768  }
 0x158   :  { %450 = vsyncadd [#allocation3], 4294966528 }
 0x159   :  { %340 = vsyncpa [#allocation3], 1 }

</bundles_post_ra>
